<compile_context>
chip_gen: v6e
topology: v6e:2x2x1
jax: 0.10.0
libtpu: 0.0.40
codegen_flags: <defaults>
</compile_context>

<pallas_src>
import jax
import jax.numpy as jnp
from jax.experimental import pallas as pl
from jax.experimental.pallas import tpu as pltpu


def _rev_seq_kernel(x_ref, wf_ref, bf_ref, wg_ref, bg_ref, y_ref):
    """Applies L reversible blocks to one row-tile.

    x_ref          : (TR, 2D)  f32 input tile (x1 | x2 along lanes)
    wf_ref, wg_ref : (L, D, D) per-depth linear weights for f / g (f32 or bf16)
    bf_ref, bg_ref : (L, D)    per-depth biases for f / g (f32)
    y_ref          : (TR, 2D)  f32 output tile (y1 | y2 along lanes)
    """
    num_blocks = wf_ref.shape[0]
    D = wf_ref.shape[2]
    mm_dtype = wf_ref.dtype

    # One lane-dense load; the half-feature split is a cheap static slice.
    x = x_ref[...]
    x1 = x[:, :D]
    x2 = x[:, D:]

    # Static trace-time unroll over depth (L is small and known at trace time):
    # every weight / bias slice below is a static VMEM slice.
    for l in range(num_blocks):
        wf = wf_ref[l]                       # (D, D)
        wg = wg_ref[l]                       # (D, D)
        bf = bf_ref[pl.ds(l, 1), :]          # (1, D) f32, broadcasts over rows
        bg = bg_ref[pl.ds(l, 1), :]
        # y1 = x1 + f(x2)   (f = Linear; matmul in mm_dtype, f32 accumulate)
        y1 = x1 + jnp.dot(x2.astype(mm_dtype), wf,
                          preferred_element_type=jnp.float32) + bf
        # y2 = x2 + g(y1)   (g = Linear)
        y2 = x2 + jnp.dot(y1.astype(mm_dtype), wg,
                          preferred_element_type=jnp.float32) + bg
        x1, x2 = y1, y2

    # Single full-width (lane-dense) store — no masked vst on half-lane halves.
    y_ref[...] = jnp.concatenate([x1, x2], axis=-1).astype(y_ref.dtype)


def reversible_sequence_forward(x, wf, bf, wg, bg, *, row_tile=512,
                                matmul_dtype=None):
    """x: (B, N, 2*D).  wf/wg: (L, D, D).  bf/bg: (L, D) (or (L, 1, D)).

    matmul_dtype: dtype for the MXU operands (e.g. jnp.bfloat16 on v6e/v7x);
    accumulation, biases and residual adds always stay float32.
    """
    B, N, two_d = x.shape
    D = two_d // 2
    L = wf.shape[0]
    R = B * N

    # Glue (plain JAX): flatten batch/seq into rows, keep x1|x2 lane-fused.
    x2d = x.reshape(R, two_d).astype(jnp.float32)
    wdt = jnp.float32 if matmul_dtype is None else matmul_dtype
    wf = wf.astype(wdt)
    wg = wg.astype(wdt)
    bf = bf.reshape(L, D).astype(jnp.float32)
    bg = bg.reshape(L, D).astype(jnp.float32)

    # Row tile: as tall as requested but never taller than the (sublane-padded)
    # row count; pad rows with zeros so every grid step sees a full tile.
    tr = min(row_tile, -(-R // 8) * 8)
    tr = max(8, (tr // 8) * 8)
    R_pad = -(-R // tr) * tr
    if R_pad != R:
        x2d = jnp.pad(x2d, ((0, R_pad - R), (0, 0)))

    grid = (R_pad // tr,)

    # VMEM budget: double-buffered in/out row tiles + whole-resident weights.
    w_bytes = jnp.dtype(wdt).itemsize
    tile_bytes = tr * two_d * 4
    weight_bytes = 2 * L * D * D * w_bytes + 2 * L * D * 4
    vmem_est = 2 * 2 * tile_bytes + 2 * weight_bytes
    vmem_limit = int(min(max(2 * vmem_est, 32 << 20), 48 << 20))
    # TODO(synk): if 2*L*D*D*w_bytes approaches the VMEM budget (v7x: 64 MiB),
    # switch to grid=(rows, L) with resident y1/y2 accumulators and stream one
    # (D, D) weight block per layer instead of keeping all weights resident.

    row_spec = pl.BlockSpec((tr, two_d), lambda i: (i, 0))
    w_spec = pl.BlockSpec((L, D, D), lambda i: (0, 0, 0))
    b_spec = pl.BlockSpec((L, D), lambda i: (0, 0))

    y = pl.pallas_call(
        _rev_seq_kernel,
        out_shape=jax.ShapeDtypeStruct((R_pad, two_d), jnp.float32),
        grid_spec=pltpu.PrefetchScalarGridSpec(
            num_scalar_prefetch=0,
            grid=grid,
            in_specs=[row_spec, w_spec, b_spec, w_spec, b_spec],
            out_specs=row_spec,
        ),
        compiler_params=pltpu.CompilerParams(
            dimension_semantics=("parallel",),
            vmem_limit_bytes=vmem_limit),
    )(x2d, wf, bf, wg, bg)

    # Drop row padding; output is already cat([y1, y2], dim=2) in fused layout.
    return y[:R].reshape(B, N, two_d)


def reversible_sequence_reference(x, wf, bf, wg, bg):
    """Pure-JAX reference matching the PyTorch forward semantics."""
    D = x.shape[2] // 2
    x1, x2 = x[:, :, :D], x[:, :, D:]
    for l in range(wf.shape[0]):
        y1 = x1 + jnp.einsum('bnd,de->bne', x2, wf[l]) + bf[l]
        y2 = x2 + jnp.einsum('bnd,de->bne', y1, wg[l]) + bg[l]
        x1, x2 = y1, y2
    return jnp.concatenate([x1, x2], axis=2)


if __name__ == "__main__":
    # Small shapes consistent with the module's forward: (batch, seq, 2*dim).
    D, L = 64, 3
    key = jax.random.PRNGKey(0)
    kx, kwf, kbf, kwg, kbg = jax.random.split(key, 5)

    scale = 1.0 / (D ** 0.5)
    wf = jax.random.normal(kwf, (L, D, D), dtype=jnp.float32) * scale
    bf = jax.random.normal(kbf, (L, D), dtype=jnp.float32) * 0.1
    wg = jax.random.normal(kwg, (L, D, D), dtype=jnp.float32) * scale
    bg = jax.random.normal(kbg, (L, D), dtype=jnp.float32) * 0.1

    # --- check 1: small shape, pure f32 path, tight tolerance ---------------
    B, N = 2, 8
    x = jax.random.normal(kx, (B, N, 2 * D), dtype=jnp.float32)
    out = reversible_sequence_forward(x, wf, bf, wg, bg)
    out = jax.block_until_ready(out)
    ref = reversible_sequence_reference(x, wf, bf, wg, bg)
    assert out.shape == (B, N, 2 * D)
    assert jnp.allclose(out, ref, atol=1e-4, rtol=1e-4), "f32 mismatch vs reference"

    # --- check 2: non-multiple row count + bf16 MXU operands ----------------
    B2, N2 = 4, 100                      # R = 400 -> single exact 400-row tile
    x2 = jax.random.normal(kx, (B2, N2, 2 * D), dtype=jnp.float32)
    out2 = reversible_sequence_forward(x2, wf, bf, wg, bg,
                                       row_tile=512, matmul_dtype=jnp.bfloat16)
    out2 = jax.block_until_ready(out2)
    ref2 = reversible_sequence_reference(x2, wf, bf, wg, bg)
    assert out2.shape == (B2, N2, 2 * D)
    assert jnp.allclose(out2, ref2, atol=2.5e-1, rtol=2.5e-2), "bf16 mismatch vs reference"

    # --- check 3: multi-tile grid (row padding + >1 grid step) --------------
    B3, N3 = 2, 150                      # R = 300, row_tile=128 -> 3-step grid
    x3 = jax.random.normal(kx, (B3, N3, 2 * D), dtype=jnp.float32)
    out3 = reversible_sequence_forward(x3, wf, bf, wg, bg, row_tile=128)
    out3 = jax.block_until_ready(out3)
    ref3 = reversible_sequence_reference(x3, wf, bf, wg, bg)
    assert out3.shape == (B3, N3, 2 * D)
    assert jnp.allclose(out3, ref3, atol=1e-4, rtol=1e-4), "multi-tile mismatch"

    # TODO(synk): backward_pass / _ReversibleFunction.backward (activation
    # reconstruction) and training-time layer_dropout / RNG forking are
    # autograd / training machinery, not part of the forward kernel.
    print("KERNEL_OK")
</pallas_src>

<mosaic_0001>
module attributes {stable_mosaic.version = 11 : i64} {
  func.func @_rev_seq_kernel(%arg0: i32, %arg1: memref<16x128xf32, #tpu.memory_space<vmem>>, %arg2: memref<3x64x64xf32, #tpu.memory_space<vmem>>, %arg3: memref<3x64xf32, #tpu.memory_space<vmem>>, %arg4: memref<3x64x64xf32, #tpu.memory_space<vmem>>, %arg5: memref<3x64xf32, #tpu.memory_space<vmem>>, %arg6: memref<16x128xf32, #tpu.memory_space<vmem>>) attributes {dimension_semantics = [#tpu.dimension_semantics<parallel>], iteration_bounds = array<i64: 1>, scalar_prefetch = 0 : i64, scratch_operands = 0 : i64, tpu.core_type = #tpu.core_type<tc>, window_params = [{transform_indices = @transform_0, window_bounds = array<i64: 16, 128>}, {pipeline_mode = #tpu.pipeline_mode<synchronous>, transform_indices = @transform_1, window_bounds = array<i64: 3, 64, 64>}, {pipeline_mode = #tpu.pipeline_mode<synchronous>, transform_indices = @transform_2, window_bounds = array<i64: 3, 64>}, {pipeline_mode = #tpu.pipeline_mode<synchronous>, transform_indices = @transform_3, window_bounds = array<i64: 3, 64, 64>}, {pipeline_mode = #tpu.pipeline_mode<synchronous>, transform_indices = @transform_4, window_bounds = array<i64: 3, 64>}, {transform_indices = @transform_5, window_bounds = array<i64: 16, 128>}]} {
    %c0 = arith.constant 0 : index
    %c0_0 = arith.constant 0 : index
    %0 = vector.load %arg1[%c0, %c0_0] : memref<16x128xf32, #tpu.memory_space<vmem>>, vector<16x128xf32>
    %1 = vector.extract_strided_slice %0 {offsets = [0, 0], sizes = [16, 64], strides = [1, 1]} : vector<16x128xf32> to vector<16x64xf32>
    %2 = vector.extract_strided_slice %0 {offsets = [0, 64], sizes = [16, 64], strides = [1, 1]} : vector<16x128xf32> to vector<16x64xf32>
    %c0_1 = arith.constant 0 : index
    %c0_2 = arith.constant 0 : index
    %c0_3 = arith.constant 0 : index
    %3 = vector.load %arg2[%c0_1, %c0_2, %c0_3] : memref<3x64x64xf32, #tpu.memory_space<vmem>>, vector<1x64x64xf32>
    %4 = vector.shape_cast %3 : vector<1x64x64xf32> to vector<64x64xf32>
    %c0_4 = arith.constant 0 : index
    %c0_5 = arith.constant 0 : index
    %c0_6 = arith.constant 0 : index
    %5 = vector.load %arg4[%c0_4, %c0_5, %c0_6] : memref<3x64x64xf32, #tpu.memory_space<vmem>>, vector<1x64x64xf32>
    %6 = vector.shape_cast %5 : vector<1x64x64xf32> to vector<64x64xf32>
    %c0_7 = arith.constant 0 : index
    %c0_8 = arith.constant 0 : index
    %7 = vector.load %arg3[%c0_7, %c0_8] : memref<3x64xf32, #tpu.memory_space<vmem>>, vector<1x64xf32>
    %c0_9 = arith.constant 0 : index
    %c0_10 = arith.constant 0 : index
    %8 = vector.load %arg5[%c0_9, %c0_10] : memref<3x64xf32, #tpu.memory_space<vmem>>, vector<1x64xf32>
    %cst = arith.constant dense<0.000000e+00> : vector<16x64xf32>
    %9 = tpu.matmul %2, %4, %cst {dimension_numbers = #tpu.dot_dimension_numbers<[1], [0], [0], [1], [0, 0, 1, 1], [], []>} : vector<16x64xf32>, vector<64x64xf32>, vector<16x64xf32> -> vector<16x64xf32>
    %10 = arith.addf %1, %9 : vector<16x64xf32>
    %11 = vector.broadcast %7 : vector<1x64xf32> to vector<16x64xf32>
    %12 = arith.addf %10, %11 : vector<16x64xf32>
    %cst_11 = arith.constant dense<0.000000e+00> : vector<16x64xf32>
    %13 = tpu.matmul %12, %6, %cst_11 {dimension_numbers = #tpu.dot_dimension_numbers<[1], [0], [0], [1], [0, 0, 1, 1], [], []>} : vector<16x64xf32>, vector<64x64xf32>, vector<16x64xf32> -> vector<16x64xf32>
    %14 = arith.addf %2, %13 : vector<16x64xf32>
    %15 = vector.broadcast %8 : vector<1x64xf32> to vector<16x64xf32>
    %16 = arith.addf %14, %15 : vector<16x64xf32>
    %c1 = arith.constant 1 : index
    %c0_12 = arith.constant 0 : index
    %c0_13 = arith.constant 0 : index
    %17 = vector.load %arg2[%c1, %c0_12, %c0_13] : memref<3x64x64xf32, #tpu.memory_space<vmem>>, vector<1x64x64xf32>
    %18 = vector.shape_cast %17 : vector<1x64x64xf32> to vector<64x64xf32>
    %c1_14 = arith.constant 1 : index
    %c0_15 = arith.constant 0 : index
    %c0_16 = arith.constant 0 : index
    %19 = vector.load %arg4[%c1_14, %c0_15, %c0_16] : memref<3x64x64xf32, #tpu.memory_space<vmem>>, vector<1x64x64xf32>
    %20 = vector.shape_cast %19 : vector<1x64x64xf32> to vector<64x64xf32>
    %c1_17 = arith.constant 1 : index
    %c0_18 = arith.constant 0 : index
    %21 = vector.load %arg3[%c1_17, %c0_18] : memref<3x64xf32, #tpu.memory_space<vmem>>, vector<1x64xf32>
    %c1_19 = arith.constant 1 : index
    %c0_20 = arith.constant 0 : index
    %22 = vector.load %arg5[%c1_19, %c0_20] : memref<3x64xf32, #tpu.memory_space<vmem>>, vector<1x64xf32>
    %cst_21 = arith.constant dense<0.000000e+00> : vector<16x64xf32>
    %23 = tpu.matmul %16, %18, %cst_21 {dimension_numbers = #tpu.dot_dimension_numbers<[1], [0], [0], [1], [0, 0, 1, 1], [], []>} : vector<16x64xf32>, vector<64x64xf32>, vector<16x64xf32> -> vector<16x64xf32>
    %24 = arith.addf %12, %23 : vector<16x64xf32>
    %25 = vector.broadcast %21 : vector<1x64xf32> to vector<16x64xf32>
    %26 = arith.addf %24, %25 : vector<16x64xf32>
    %cst_22 = arith.constant dense<0.000000e+00> : vector<16x64xf32>
    %27 = tpu.matmul %26, %20, %cst_22 {dimension_numbers = #tpu.dot_dimension_numbers<[1], [0], [0], [1], [0, 0, 1, 1], [], []>} : vector<16x64xf32>, vector<64x64xf32>, vector<16x64xf32> -> vector<16x64xf32>
    %28 = arith.addf %16, %27 : vector<16x64xf32>
    %29 = vector.broadcast %22 : vector<1x64xf32> to vector<16x64xf32>
    %30 = arith.addf %28, %29 : vector<16x64xf32>
    %c2 = arith.constant 2 : index
    %c0_23 = arith.constant 0 : index
    %c0_24 = arith.constant 0 : index
    %31 = vector.load %arg2[%c2, %c0_23, %c0_24] : memref<3x64x64xf32, #tpu.memory_space<vmem>>, vector<1x64x64xf32>
    %32 = vector.shape_cast %31 : vector<1x64x64xf32> to vector<64x64xf32>
    %c2_25 = arith.constant 2 : index
    %c0_26 = arith.constant 0 : index
    %c0_27 = arith.constant 0 : index
    %33 = vector.load %arg4[%c2_25, %c0_26, %c0_27] : memref<3x64x64xf32, #tpu.memory_space<vmem>>, vector<1x64x64xf32>
    %34 = vector.shape_cast %33 : vector<1x64x64xf32> to vector<64x64xf32>
    %c2_28 = arith.constant 2 : index
    %c0_29 = arith.constant 0 : index
    %35 = vector.load %arg3[%c2_28, %c0_29] : memref<3x64xf32, #tpu.memory_space<vmem>>, vector<1x64xf32>
    %c2_30 = arith.constant 2 : index
    %c0_31 = arith.constant 0 : index
    %36 = vector.load %arg5[%c2_30, %c0_31] : memref<3x64xf32, #tpu.memory_space<vmem>>, vector<1x64xf32>
    %cst_32 = arith.constant dense<0.000000e+00> : vector<16x64xf32>
    %37 = tpu.matmul %30, %32, %cst_32 {dimension_numbers = #tpu.dot_dimension_numbers<[1], [0], [0], [1], [0, 0, 1, 1], [], []>} : vector<16x64xf32>, vector<64x64xf32>, vector<16x64xf32> -> vector<16x64xf32>
    %38 = arith.addf %26, %37 : vector<16x64xf32>
    %39 = vector.broadcast %35 : vector<1x64xf32> to vector<16x64xf32>
    %40 = arith.addf %38, %39 : vector<16x64xf32>
    %cst_33 = arith.constant dense<0.000000e+00> : vector<16x64xf32>
    %41 = tpu.matmul %40, %34, %cst_33 {dimension_numbers = #tpu.dot_dimension_numbers<[1], [0], [0], [1], [0, 0, 1, 1], [], []>} : vector<16x64xf32>, vector<64x64xf32>, vector<16x64xf32> -> vector<16x64xf32>
    %42 = arith.addf %30, %41 : vector<16x64xf32>
    %43 = vector.broadcast %36 : vector<1x64xf32> to vector<16x64xf32>
    %44 = arith.addf %42, %43 : vector<16x64xf32>
    %45 = tpu.concatenate %40, %44 in 1 : vector<16x64xf32>, vector<16x64xf32> -> vector<16x128xf32>
    %c0_34 = arith.constant 0 : index
    %c0_35 = arith.constant 0 : index
    %46 = vector.load %arg6[%c0_34, %c0_35] : memref<16x128xf32, #tpu.memory_space<vmem>>, vector<16x128xf32>
    tpu.vector_store %arg6[%c0_34, %c0_35], %45 {strides = array<i32>} : memref<16x128xf32, #tpu.memory_space<vmem>>, vector<16x128xf32>,
    return
  }
  func.func @transform_0(%arg0: i32) -> (i32, i32) {
    %c0_i32 = arith.constant 0 : i32
    %c0_i32_0 = arith.constant 0 : i32
    return %arg0, %c0_i32 : i32, i32
  }
  func.func @transform_1(%arg0: i32) -> (i32, i32, i32) {
    %c0_i32 = arith.constant 0 : i32
    %c0_i32_0 = arith.constant 0 : i32
    %c0_i32_1 = arith.constant 0 : i32
    %c0_i32_2 = arith.constant 0 : i32
    return %c0_i32, %c0_i32_0, %c0_i32_1 : i32, i32, i32
  }
  func.func @transform_2(%arg0: i32) -> (i32, i32) {
    %c0_i32 = arith.constant 0 : i32
    %c0_i32_0 = arith.constant 0 : i32
    %c0_i32_1 = arith.constant 0 : i32
    return %c0_i32, %c0_i32_0 : i32, i32
  }
  func.func @transform_3(%arg0: i32) -> (i32, i32, i32) {
    %c0_i32 = arith.constant 0 : i32
    %c0_i32_0 = arith.constant 0 : i32
    %c0_i32_1 = arith.constant 0 : i32
    %c0_i32_2 = arith.constant 0 : i32
    return %c0_i32, %c0_i32_0, %c0_i32_1 : i32, i32, i32
  }
  func.func @transform_4(%arg0: i32) -> (i32, i32) {
    %c0_i32 = arith.constant 0 : i32
    %c0_i32_0 = arith.constant 0 : i32
    %c0_i32_1 = arith.constant 0 : i32
    return %c0_i32, %c0_i32_0 : i32, i32
  }
  func.func @transform_5(%arg0: i32) -> (i32, i32) {
    %c0_i32 = arith.constant 0 : i32
    %c0_i32_0 = arith.constant 0 : i32
    return %arg0, %c0_i32 : i32, i32
  }
}

</mosaic_0001>

<bundles_post_ra>
// kernel: tpu_custom_call.1
= control target key start
LH: loop header
LB: loop body
LE: loop exit
PB: predicated region body
PF: predicated region fallthrough
CT: control target
= control target key end

     0   :  { %10 = vsyncpa [#allocation3], 0  ;;  %s1185_s0 = inlined_call_operand.hbm [shape: f32[16,128], index: 0, kind: input, shape index: {}]   ;;  %s1186_s1 = inlined_call_operand.hbm [shape: f32[3,64,64], index: 1, kind: input, shape index: {}]   ;;  %s1187_s2 = inlined_call_operand.hbm [shape: f32[3,64], index: 2, kind: input, shape index: {}]   ;;  %s1188_s3 = inlined_call_operand.hbm [shape: f32[3,64,64], index: 3, kind: input, shape index: {}]   ;;  %s1189_s4 = inlined_call_operand.vmem [shape: f32[3,64], index: 4, kind: input, shape index: {}]   ;;  %s1190_s5 = inlined_call_operand.hbm [shape: f32[16,128], index: 5, kind: output, shape index: {}]  }
   0x1   :  { %11 = vsyncpa [#allocation6], 0 }
   0x2   :  { %12 = vsyncpa [#allocation9], 0 }
   0x3   :  { %13 = vsyncpa [#allocation4], 0  ;;  %s1048_s18 = smov [#allocation5]   ;;  %s1049_s20 = smov [#allocation2]  }
   0x4   :  { %s31_s19 = sshll.u32 %s1048_s18, 4  ;;  %s19_s21 = sshll.u32 %s1049_s20, 4  ;;  %s32_s19 = int_to_ptr.vmem [resolvable:$true] %s31_s19  ;;  %s20_s21 = int_to_ptr.vmem [resolvable:$true] %s19_s21 }
   0x5   :  { %s948_s22 = scalar_lea.vmem %s32_s19, 3072  ;;  %p953_p1 = scmp.lt.s32.totalorder %s32_s19, %s32_s19 }
   0x6   :  { %p949_p0 = scmp.ne.s32.totalorder %s32_s19, %s948_s22  ;;  %p954_p2 = scmp.lt.s32.totalorder %s948_s22, %s948_s22 }
   0x8   :  { %p955_p3 = por %p954_p2, %p953_p1 }
   0xa   :  { %p956_p4 = pnand %p955_p3, %p949_p0 }
   0xc   :  { %959 = shalt.err (!%p956_p4)
}
   0xd   :  { %s1050_s23 = smov 128   ;;  %s1051_s24 = smov 8  }
   0xe   :  { %37 = dma.hbm_to_vmem [thread:$0]  %s1186_s1, 3072, %s32_s19, [#allocation6], %s1050_s23, %s1050_s23, %s1051_s24  }
   0xf   :  { %s968_s27 = scalar_lea.vmem %s20_s21, 256  ;;  %p973_p6 = scmp.lt.s32.totalorder %s20_s21, %s20_s21 }
  0x10   :  { %p969_p5 = scmp.ne.s32.totalorder %s20_s21, %s968_s27  ;;  %p974_p7 = scmp.lt.s32.totalorder %s968_s27, %s968_s27 }
  0x12   :  { %p975_p8 = por %p974_p7, %p973_p6 }
  0x14   :  { %p976_p9 = pnand %p975_p8, %p969_p5 }
  0x16   :  { %979 = shalt.err (!%p976_p9)
}
  0x17   :  { %25 = dma.hbm_to_vmem [thread:$0]  %s1185_s0, 256, %s20_s21, [#allocation3], %s1050_s23, %s1050_s23, %s1051_s24  }
  0x18   :  { %s1052_s30 = smov [#allocation7]   ;;  %s1053_s7 = smov [#allocation8]  }
  0x19   :  { %s44_s6 = sshll.u32 %s1052_s30, 4  ;;  %s53_s8 = sshll.u32 %s1053_s7, 4  ;;  %s45_s6 = int_to_ptr.vmem [resolvable:$true] %s44_s6  ;;  %s54_s8 = int_to_ptr.vmem [resolvable:$true] %s53_s8 }
  0x1a   :  { %s988_s1 = scalar_lea.vmem %s45_s6, 64  ;;  %p993_p11 = scmp.lt.s32.totalorder %s45_s6, %s45_s6 }
  0x1b   :  { %p989_p10 = scmp.ne.s32.totalorder %s45_s6, %s988_s1  ;;  %p994_p12 = scmp.lt.s32.totalorder %s988_s1, %s988_s1 }
  0x1d   :  { %p995_p13 = por %p994_p12, %p993_p11 }
  0x1f   :  { %p996_p0 = pnand %p995_p13, %p989_p10 }
  0x21   :  { %999 = shalt.err (!%p996_p0)
}
  0x22   :  { %47 = dma.hbm_to_vmem [thread:$0]  %s1187_s2, 64, %s45_s6, [#allocation6]  }
  0x23   :  { %s1008_s11 = scalar_lea.vmem %s54_s8, 3072  ;;  %p1013_p2 = scmp.lt.s32.totalorder %s54_s8, %s54_s8 }
  0x24   :  { %p1009_p1 = scmp.ne.s32.totalorder %s54_s8, %s1008_s11  ;;  %p1014_p3 = scmp.lt.s32.totalorder %s1008_s11, %s1008_s11 }
  0x26   :  { %p1015_p4 = por %p1014_p3, %p1013_p2 }
  0x28   :  { %p1016_p5 = pnand %p1015_p4, %p1009_p1 }
  0x2a   :  { %1019 = shalt.err (!%p1016_p5)
}
  0x2b   :  { %59 = dma.hbm_to_vmem [thread:$0]  %s1188_s3, 3072, %s54_s8, [#allocation9], %s1050_s23, %s1050_s23, %s1051_s24  }
  0x2c   :  { %1040 = dma.done.wait [#allocation3], 256  }
  0x2d   :  { %1041 = vsyncadd [#allocation3], 4294967040 }
  0x2e   :  { %1042 = dma.done.wait [#allocation6], 3136  }
  0x2f   :  { %1043 = vsyncadd [#allocation6], 4294964160 }
  0x30   :  { %1044 = dma.done.wait [#allocation9], 3072  }
  0x31   :  { %1045 = vsyncadd [#allocation9], 4294964224  ;;  %v1107_v0 = vld [vmem:[#allocation2] sm:$0xff]  ;;  %v83_v1 = vld [vmem:[#allocation5 + $0x38] sm:$0xff]  ;;  %s1054_s2 = smov 64   ;;  %vm100_vm0 = vcmask 523264  }
  0x32   :  { %96 = vrot.lane.b32.xlu0 %v1107_v0, %s1054_s2  ;;  %818 = vmatprep.subr.mxu0 %v83_v1  ;;  %v82_v2 = vld [vmem:[#allocation5 + $0x30] sm:$0xff]  ;;  %v1111_v3 = vld [vmem:[#allocation2 + $0x8] sm:$0xff]  ;;  %v81_v4 = vld [vmem:[#allocation5 + $0x28] sm:$0xff]  ;;  %s1055_s18 = smov [#allocation10]  }
  0x33   :  { %819 = vmatpush3.msra.mxu0 %v83_v1  ;;  %v91_v5 = vld [vmem:[#allocation8 + $0x38] sm:$0xff]  ;;  %v90_v7 = vld [vmem:[#allocation8 + $0x30] sm:$0xff]  ;;  %v89_v9 = vld [vmem:[#allocation8 + $0x28] sm:$0xff]  ;;  %s726_s19 = sshll.u32 %s1055_s18, 4  ;;  %s727_s19 = int_to_ptr.vmem [resolvable:$true] %s726_s19 }
  0x34   :  { %820 = vmatprep.subr.mxu0 %v82_v2  ;;  %v80_v6 = vld [vmem:[#allocation5 + $0x20] sm:$0xff]  ;;  %837 = vmatprep.subr.mxu1 %v91_v5  ;;  %v79_v8 = vld [vmem:[#allocation5 + $0x18] sm:$0xff]  ;;  %v78_v10 = vld [vmem:[#allocation5 + $0x10] sm:$0xff]  ;;  %s1020_s20 = scalar_lea.vmem %s727_s19, 256  ;;  %p1025_p7 = scmp.lt.s32.totalorder %s727_s19, %s727_s19 }
  0x35   :  { %821 = vmatpush3.msra.mxu0 %v82_v2  ;;  %838 = vmatpush3.msra.mxu1 %v91_v5  ;;  %v88_v11 = vld [vmem:[#allocation8 + $0x20] sm:$0xff]  ;;  %v87_v16 = vld [vmem:[#allocation8 + $0x18] sm:$0xff]  ;;  %v86_v17 = vld [vmem:[#allocation8 + $0x10] sm:$0xff]  ;;  %p1021_p6 = scmp.ne.s32.totalorder %s727_s19, %s1020_s20  ;;  %p1026_p8 = scmp.lt.s32.totalorder %s1020_s20, %s1020_s20 }
  0x36   :  { %98 = vrot.lane.b32.xlu0 %v1111_v3, %s1054_s2  ;;  %822 = vmatprep.subr.mxu0 %v81_v4  ;;  %v77_v12 = vld [vmem:[#allocation5 + $0x8] sm:$0xff]  ;;  %v76_v13 = vld [vmem:[#allocation5] sm:$0xff]  ;;  %v745_v27 = vld [vmem:[%s1189_s4] ss:$0 sm:$0xff] }
  0x37   :  { %823 = vmatpush3.msra.mxu0 %v81_v4  ;;  %839 = vmatprep.subr.mxu1 %v90_v7  ;;  %v85_v18 = vld [vmem:[#allocation8 + $0x8] sm:$0xff]  ;;  %v84_v19 = vld [vmem:[#allocation8] sm:$0xff]  ;;  %v742_v23 = vld [vmem:[#allocation7] ss:$0 sm:$0xff]  ;;  %p1027_p9 = por %p1026_p8, %p1025_p7 }
  0x38   :  { %824 = vmatprep.subr.mxu0 %v80_v6  ;;  %840 = vmatpush3.msra.mxu1 %v90_v7  ;;  %v297_v28 = vld [vmem:[#allocation5 + $0x78] sm:$0xff]  ;;  %v296_v29 = vld [vmem:[#allocation5 + $0x70] sm:$0xff]  ;;  %v295_v31 = vld [vmem:[#allocation5 + $0x68] sm:$0xff] }
  0x39   :  { %825 = vmatpush3.msra.mxu0 %v80_v6  ;;  %841 = vmatprep.subr.mxu1 %v89_v9  ;;  %v294_v33 = vld [vmem:[#allocation5 + $0x60] sm:$0xff]  ;;  %v293_v34 = vld [vmem:[#allocation5 + $0x58] sm:$0xff]  ;;  %v292_v35 = vld [vmem:[#allocation5 + $0x50] sm:$0xff]  ;;  %p1028_p10 = pnand %p1027_p9, %p1021_p6 }
  0x3a   :  { %826 = vmatprep.subr.mxu0 %v79_v8  ;;  %842 = vmatpush3.msra.mxu1 %v89_v9  ;;  %v291_v36 = vld [vmem:[#allocation5 + $0x48] sm:$0xff]  ;;  %v290_v37 = vld [vmem:[#allocation5 + $0x40] sm:$0xff]  ;;  %v305_v39 = vld [vmem:[#allocation8 + $0x70] sm:$0xff] }
  0x3b   :  { %827 = vmatpush3.msra.mxu0 %v79_v8  ;;  %843 = vmatprep.subr.mxu1 %v88_v11  ;;  %v306_v38 = vld [vmem:[#allocation8 + $0x78] sm:$0xff]  ;;  %v304_v40 = vld [vmem:[#allocation8 + $0x68] sm:$0xff]  ;;  %v303_v43 = vld [vmem:[#allocation8 + $0x60] sm:$0xff] }
  0x3c   :  { %828 = vmatprep.subr.mxu0 %v78_v10  ;;  %844 = vmatpush3.msra.mxu1 %v88_v11  ;;  %v302_v51 = vld [vmem:[#allocation8 + $0x58] sm:$0xff]  ;;  %v301_v52 = vld [vmem:[#allocation8 + $0x50] sm:$0xff]  ;;  %v300_v53 = vld [vmem:[#allocation8 + $0x48] sm:$0xff] }
  0x3d   :  { %829 = vmatpush3.msra.mxu0 %v78_v10  ;;  %845 = vmatprep.subr.mxu1 %v87_v16  ;;  %v299_v54 = vld [vmem:[#allocation8 + $0x40] sm:$0xff]  ;;  %v748_v58 = vld [vmem:[#allocation7 + $0x1] ss:$0 sm:$0xff]  ;;  %v511_v62 = vld [vmem:[#allocation5 + $0xb8] sm:$0xff] }
  0x3e   :  { %830 = vmatprep.subr.mxu0 %v77_v12  ;;  %846 = vmatpush3.msra.mxu1 %v87_v16  ;;  %v510_v63 = vld [vmem:[#allocation5 + $0xb0] sm:$0xff]  ;;  %v508_v2 = vld [vmem:[#allocation5 + $0xa0] sm:$0xff]  ;;  %v507_v4 = vld [vmem:[#allocation5 + $0x98] sm:$0xff] }
  0x3f   :  { %831 = vmatpush3.msra.mxu0 %v77_v12  ;;  %847 = vmatprep.subr.mxu1 %v86_v17  ;;  %v751_v5 = vld [vmem:[%s1189_s4 + $0x1] ss:$0 sm:$0xff]  ;;  %v505_v7 = vld [vmem:[#allocation5 + $0x88] sm:$0xff]  ;;  %v504_v8 = vld [vmem:[#allocation5 + $0x80] sm:$0xff] }
  0x40   :  { %832 = vmatprep.subr.mxu0 %v76_v13  ;;  %848 = vmatpush3.msra.mxu1 %v86_v17  ;;  %v506_v6 = vld [vmem:[#allocation5 + $0x90] sm:$0xff]  ;;  %v520_v9 = vld [vmem:[#allocation8 + $0xb8] sm:$0xff]  ;;  %v517_v12 = vld [vmem:[#allocation8 + $0xa0] sm:$0xff] }
  0x41   :  { %833 = vmatpush3.msra.mxu0 %v76_v13  ;;  %849 = vmatprep.subr.mxu1 %v85_v18  ;;  %v519_v10 = vld [vmem:[#allocation8 + $0xb0] sm:$0xff]  ;;  %v518_v11 = vld [vmem:[#allocation8 + $0xa8] sm:$0xff] }
  0x42   :  { %850 = vmatpush3.msra.mxu1 %v85_v18  ;;  %284 = vrot.lane.b32.xlu0 %v745_v27, %s1054_s2 }
  0x43   :  { %851 = vmatprep.subr.mxu1 %v84_v19  ;;  %856 = vmatprep.subr.mxu0 %v297_v28 }
  0x44   :  { %852 = vmatpush3.msra.mxu1 %v84_v19 }
  0x45   :  { %875 = vmatprep.subr.mxu1 %v306_v38 }
  0xa4   :  { %v97_v14 = vpop.permute.xlu0 %96 }
  0xa5   :  { %834 = vmatprep.mubr.msk.f32.mxu0 %vm100_vm0, %v97_v14 }
  0xa8   :  { %v99_v15 = vpop.permute.xlu0 %98 }
  0xa9   :  { %835 = vmatmul.mubr.msk.f32.vlgmr.msra.gmra.mxu0 %vm100_vm0, %v99_v15 }
  0xaa   :  { %857 = vmatpush3.msra.mxu0 %v297_v28 }
  0xab   :  { %858 = vmatprep.subr.mxu0 %v296_v29 }
  0xac   :  { %859 = vmatpush3.msra.mxu0 %v296_v29  ;;  %v754_v29 = vld [vmem:[#allocation7 + $0x2] ss:$0 sm:$0xff] }
  0xad   :  { %860 = vmatprep.subr.mxu0 %v295_v31 }
  0xae   :  { %861 = vmatpush3.msra.mxu0 %v295_v31 }
  0xaf   :  { %862 = vmatprep.subr.mxu0 %v294_v33 }
  0xb0   :  { %863 = vmatpush3.msra.mxu0 %v294_v33 }
  0xb1   :  { %864 = vmatprep.subr.mxu0 %v293_v34 }
  0xb2   :  { %865 = vmatpush3.msra.mxu0 %v293_v34 }
  0xb3   :  { %866 = vmatprep.subr.mxu0 %v292_v35 }
  0xb4   :  { %867 = vmatpush3.msra.mxu0 %v292_v35  ;;  %v285_v42 = vpop.permute.xlu0 %284  ;;  %v757_v35 = vld [vmem:[%s1189_s4 + $0x2] ss:$0 sm:$0xff] }
  0xb5   :  { %868 = vmatprep.subr.mxu0 %v291_v36 }
  0xb6   :  { %869 = vmatpush3.msra.mxu0 %v291_v36 }
  0xb7   :  { %870 = vmatprep.subr.mxu0 %v290_v37 }
  0xb8   :  { %871 = vmatpush3.msra.mxu0 %v290_v37 }
  0xb9   :  { %894 = vmatprep.subr.mxu0 %v511_v62 }
 0x169   :  { %v836_v20 = vpop.f32.mrf.mxu0 }
 0x16a   :  { %v181_v21 = vadd.f32 %v836_v20, %v1111_v3 }
 0x16b   :  { %v171_v22 = vpop.f32.mrf.mxu0 }
 0x16c   :  { %v180_v24 = vadd.f32 %v171_v22, %v1107_v0  ;;  %v1121_v26 = vadd.f32 %v742_v23, %v181_v21  ;;  %v516_v22 = vld [vmem:[#allocation8 + $0x98] sm:$0xff] }
 0x16e   :  { %v1119_v25 = vadd.f32 %v742_v23, %v180_v24  ;;  %v515_v23 = vld [vmem:[#allocation8 + $0x90] sm:$0xff]  ;;  %v514_v24 = vld [vmem:[#allocation8 + $0x88] sm:$0xff] }
 0x170   :  { %853 = vmatprep.mubr.msk.f32.mxu1 %vm100_vm0, %v1119_v25 }
 0x171   :  { %854 = vmatmul.mubr.msk.f32.vlgmr.msra.gmra.mxu1 %vm100_vm0, %v1121_v26 }
 0x172   :  { %876 = vmatpush3.msra.mxu1 %v306_v38 }
 0x173   :  { %877 = vmatprep.subr.mxu1 %v305_v39 }
 0x174   :  { %878 = vmatpush3.msra.mxu1 %v305_v39 }
 0x175   :  { %879 = vmatprep.subr.mxu1 %v304_v40 }
 0x176   :  { %880 = vmatpush3.msra.mxu1 %v304_v40 }
 0x177   :  { %881 = vmatprep.subr.mxu1 %v303_v43 }
 0x178   :  { %882 = vmatpush3.msra.mxu1 %v303_v43 }
 0x179   :  { %883 = vmatprep.subr.mxu1 %v302_v51 }
 0x17a   :  { %884 = vmatpush3.msra.mxu1 %v302_v51 }
 0x17b   :  { %885 = vmatprep.subr.mxu1 %v301_v52 }
 0x17c   :  { %886 = vmatpush3.msra.mxu1 %v301_v52 }
 0x17d   :  { %887 = vmatprep.subr.mxu1 %v300_v53 }
 0x17e   :  { %888 = vmatpush3.msra.mxu1 %v300_v53 }
 0x17f   :  { %889 = vmatprep.subr.mxu1 %v299_v54 }
 0x180   :  { %890 = vmatpush3.msra.mxu1 %v299_v54 }
 0x181   :  { %913 = vmatprep.subr.mxu1 %v520_v9 }
 0x231   :  { %v855_v30 = vpop.f32.mrf.mxu1 }
 0x233   :  { %v260_v32 = vpop.f32.mrf.mxu1 }
 0x234   :  { %271 = vrot.lane.b32.xlu1 %v260_v32, %s1054_s2 }
 0x238   :  { %273 = vrot.lane.b32.xlu1 %v855_v30, %s1054_s2 }
 0x2a6   :  { %v272_v41 = vpop.permute.xlu1 %271 }
 0x2a7   :  { %v277_v44 = vadd.f32 %v272_v41, %v1107_v0  ;;  %v509_v0 = vld [vmem:[#allocation5 + $0xa8] sm:$0xff] }
 0x2a9   :  { %v1134_v45 = vadd.f32 %v285_v42, %v277_v44 }
 0x2aa   :  { %v274_v46 = vpop.permute.xlu1 %273 }
 0x2ab   :  { %v278_v47 = vadd.f32 %v274_v46, %v1111_v3  ;;  %311 = vrot.lane.b32.xlu1 %v1134_v45, %s1054_s2 }
 0x2ad   :  { %v1139_v48 = vadd.f32 %v285_v42, %v278_v47 }
 0x2af   :  { %313 = vrot.lane.b32.xlu0 %v1139_v48, %s1054_s2 }
 0x31d   :  { %v312_v49 = vpop.permute.xlu1 %311 }
 0x31e   :  { %872 = vmatprep.mubr.msk.f32.mxu0 %vm100_vm0, %v312_v49 }
 0x321   :  { %v314_v50 = vpop.permute.xlu0 %313 }
 0x322   :  { %873 = vmatmul.mubr.msk.f32.vlgmr.msra.gmra.mxu0 %vm100_vm0, %v314_v50 }
 0x323   :  { %895 = vmatpush3.msra.mxu0 %v511_v62 }
 0x324   :  { %896 = vmatprep.subr.mxu0 %v510_v63 }
 0x325   :  { %897 = vmatpush3.msra.mxu0 %v510_v63 }
 0x326   :  { %898 = vmatprep.subr.mxu0 %v509_v0 }
 0x327   :  { %899 = vmatpush3.msra.mxu0 %v509_v0 }
 0x328   :  { %900 = vmatprep.subr.mxu0 %v508_v2 }
 0x329   :  { %901 = vmatpush3.msra.mxu0 %v508_v2 }
 0x32a   :  { %902 = vmatprep.subr.mxu0 %v507_v4 }
 0x32b   :  { %903 = vmatpush3.msra.mxu0 %v507_v4 }
 0x32c   :  { %904 = vmatprep.subr.mxu0 %v506_v6 }
 0x32d   :  { %905 = vmatpush3.msra.mxu0 %v506_v6 }
 0x32e   :  { %906 = vmatprep.subr.mxu0 %v505_v7 }
 0x32f   :  { %907 = vmatpush3.msra.mxu0 %v505_v7 }
 0x330   :  { %908 = vmatprep.subr.mxu0 %v504_v8 }
 0x331   :  { %909 = vmatpush3.msra.mxu0 %v504_v8 }
 0x3e2   :  { %v874_v55 = vpop.f32.mrf.mxu0 }
 0x3e3   :  { %v395_v56 = vadd.f32 %v874_v55, %v1121_v26 }
 0x3e4   :  { %v385_v57 = vpop.f32.mrf.mxu0 }
 0x3e5   :  { %v394_v59 = vadd.f32 %v385_v57, %v1119_v25  ;;  %v1149_v61 = vadd.f32 %v748_v58, %v395_v56  ;;  %v513_v25 = vld [vmem:[#allocation8 + $0x80] sm:$0xff] }
 0x3e7   :  { %v1147_v60 = vadd.f32 %v748_v58, %v394_v59 }
 0x3e9   :  { %891 = vmatprep.mubr.msk.f32.mxu1 %vm100_vm0, %v1147_v60 }
 0x3ea   :  { %892 = vmatmul.mubr.msk.f32.vlgmr.msra.gmra.mxu1 %vm100_vm0, %v1149_v61 }
 0x3eb   :  { %914 = vmatpush3.msra.mxu1 %v520_v9 }
 0x3ec   :  { %915 = vmatprep.subr.mxu1 %v519_v10 }
 0x3ed   :  { %916 = vmatpush3.msra.mxu1 %v519_v10 }
 0x3ee   :  { %917 = vmatprep.subr.mxu1 %v518_v11 }
 0x3ef   :  { %918 = vmatpush3.msra.mxu1 %v518_v11 }
 0x3f0   :  { %919 = vmatprep.subr.mxu1 %v517_v12 }
 0x3f1   :  { %920 = vmatpush3.msra.mxu1 %v517_v12 }
 0x3f2   :  { %921 = vmatprep.subr.mxu1 %v516_v22 }
 0x3f3   :  { %922 = vmatpush3.msra.mxu1 %v516_v22 }
 0x3f4   :  { %923 = vmatprep.subr.mxu1 %v515_v23 }
 0x3f5   :  { %924 = vmatpush3.msra.mxu1 %v515_v23 }
 0x3f6   :  { %925 = vmatprep.subr.mxu1 %v514_v24 }
 0x3f7   :  { %926 = vmatpush3.msra.mxu1 %v514_v24 }
 0x3f8   :  { %927 = vmatprep.subr.mxu1 %v513_v25 }
 0x3f9   :  { %928 = vmatpush3.msra.mxu1 %v513_v25 }
 0x4aa   :  { %v893_v1 = vpop.f32.mrf.mxu1 }
 0x4ab   :  { %487 = vrot.lane.b32.xlu0 %v893_v1, %s1054_s2 }
 0x4ac   :  { %v474_v3 = vpop.f32.mrf.mxu1 }
 0x4ad   :  { %485 = vrot.lane.b32.xlu1 %v474_v3, %s1054_s2 }
 0x4b1   :  { %498 = vrot.lane.b32.xlu1 %v751_v5, %s1054_s2 }
 0x51d   :  { %v488_v13 = vpop.permute.xlu0 %487 }
 0x51e   :  { %v492_v15 = vadd.f32 %v488_v13, %v1139_v48 }
 0x51f   :  { %v486_v14 = vpop.permute.xlu1 %485 }
 0x520   :  { %v491_v16 = vadd.f32 %v486_v14, %v1134_v45 }
 0x523   :  { %v499_v17 = vpop.permute.xlu1 %498 }
 0x524   :  { %v501_v18 = vadd.f32 %v499_v17, %v491_v16  ;;  %v502_v19 = vadd.f32 %v499_v17, %v492_v15 }
 0x526   :  { %527 = vrot.lane.b32.xlu1 %v502_v19, %s1054_s2  ;;  %525 = vrot.lane.b32.xlu0 %v501_v18, %s1054_s2 }
 0x598   :  { %v528_v20 = vpop.permute.xlu1 %527  ;;  %v526_v21 = vpop.permute.xlu0 %525 }
 0x599   :  { %910 = vmatprep.mubr.msk.f32.mxu0 %vm100_vm0, %v526_v21 }
 0x59a   :  { %911 = vmatmul.mubr.msk.f32.vlgmr.msra.gmra.mxu0 %vm100_vm0, %v528_v20 }
 0x65a   :  { %v912_v26 = vpop.f32.mrf.mxu0 }
 0x65b   :  { %v609_v27 = vadd.f32 %v912_v26, %v1149_v61 }
 0x65c   :  { %v599_v28 = vpop.f32.mrf.mxu0 }
 0x65d   :  { %v608_v30 = vadd.f32 %v599_v28, %v1147_v60  ;;  %v615_v32 = vadd.f32 %v754_v29, %v609_v27 }
 0x65f   :  { %v614_v31 = vadd.f32 %v754_v29, %v608_v30 }
 0x661   :  { %929 = vmatprep.mubr.msk.f32.mxu1 %vm100_vm0, %v614_v31 }
 0x662   :  { %930 = vmatmul.mubr.msk.f32.vlgmr.msra.gmra.mxu1 %vm100_vm0, %v615_v32 }
 0x722   :  { %v931_v33 = vpop.f32.mrf.mxu1 }
 0x723   :  { %701 = vrot.lane.b32.xlu1 %v931_v33, %s1054_s2 }
 0x724   :  { %v688_v34 = vpop.f32.mrf.mxu1 }
 0x725   :  { %699 = vrot.lane.b32.xlu0 %v688_v34, %s1054_s2 }
 0x729   :  { %712 = vrot.lane.b32.xlu0 %v757_v35, %s1054_s2 }
 0x795   :  { %v702_v36 = vpop.permute.xlu1 %701 }
 0x796   :  { %v706_v38 = vadd.f32 %v702_v36, %v502_v19 }
 0x797   :  { %v700_v37 = vpop.permute.xlu0 %699 }
 0x798   :  { %v705_v39 = vadd.f32 %v700_v37, %v501_v18 }
 0x79b   :  { %v713_v40 = vpop.permute.xlu0 %712 }
 0x79c   :  { %v715_v41 = vadd.f32 %v713_v40, %v705_v39  ;;  %v716_v42 = vadd.f32 %v713_v40, %v706_v38 }
 0x79e   :  { %v717_v43 = vsel %vm100_vm0, %v614_v31, %v715_v41  ;;  %v718_v44 = vsel %vm100_vm0, %v615_v32, %v716_v42 }
 0x79f   :  { %719 = vst [vmem:[#allocation10] sm:$0xff] %v717_v43  ;;  %720 = vst [vmem:[#allocation10 + $0x8] sm:$0xff] %v718_v44 }
 0x7a0   :  { %1031 = shalt.err (!%p1028_p10)
}
 0x7a1   :  { %732 = dma.vmem_to_hbm [thread:$0]  %s727_s19, 256, %s1190_s5, [#allocation4], %s1050_s23, %s1050_s23, %s1051_s24  }
 0x7a2   :  { %1046 = dma.done.wait [#allocation4], 256  }
 0x7a3   :  { %1047 = vsyncadd [#allocation4], 4294967040 }
 0x7a4   :  { %736 = vsyncpa [#allocation3], 1 }
 0x7a5   :  { %737 = vsyncpa [#allocation6], 1 }
 0x7a6   :  { %738 = vsyncpa [#allocation9], 1 }
 0x7a7   :  { %739 = vsyncpa [#allocation4], 1 }

</bundles_post_ra>
